<compile_context>
chip_gen: v7x
topology: tpu7x:2x2x1
jax: 0.10.0
libtpu: 0.0.40
codegen_flags: <defaults>
</compile_context>

<pallas_src>
import functools
import numpy as np

import jax
import jax.numpy as jnp
from jax.experimental import pallas as pl
from jax.experimental.pallas import tpu as pltpu

HID = 1000        # LSTM hidden size (fixed by the PyTorch module)
HPAD = 1024       # lane-aligned padding of hidden / per-gate width
_KC = 512         # in-kernel K-chunk size for large dots


def _ceil_to(x, m):
    return ((x + m - 1) // m) * m


def _pick_tile(p, prefs=(512, 256, 128)):
    for t in prefs:
        if p % t == 0:
            return t
    return p


# --------------------------------------------------------------------------- #
# In-kernel helpers: K-chunked bf16 matmuls with fp32 accumulation.
# --------------------------------------------------------------------------- #
def _dot_k_chunks_2d(x_b, w_ref):
    """x_b: (rows, K) bf16 value; w_ref: (K, N) bf16 ref.  fp32 result."""
    rows, K = x_b.shape
    N = w_ref.shape[-1]
    kc = min(_KC, K)
    acc = jnp.zeros((rows, N), jnp.float32)
    for c in range(K // kc):
        acc = acc + jnp.dot(x_b[:, c * kc:(c + 1) * kc],
                            w_ref[c * kc:(c + 1) * kc, :],
                            preferred_element_type=jnp.float32)
    return acc


def _dot_k_chunks_stacked(x_b, w_ref, base):
    """x_b: (rows, K) bf16 value; w_ref: (n_chunks, _KC, N) bf16 ref.
    Uses chunks [base, base + K//_KC)."""
    rows, K = x_b.shape
    N = w_ref.shape[-1]
    kc = w_ref.shape[-2]
    acc = jnp.zeros((rows, N), jnp.float32)
    for c in range(K // kc):
        acc = acc + jnp.dot(x_b[:, c * kc:(c + 1) * kc],
                            w_ref[base + c],
                            preferred_element_type=jnp.float32)
    return acc


# --------------------------------------------------------------------------- #
# Kernel 1: tiled matmul, bf16 operands, fp32 accumulator, fused epilogue
#           (per-column scale/shift = folded BN, optional residual add, ReLU),
#           bf16 output (activations stay bf16 end-to-end).
# --------------------------------------------------------------------------- #
def _matmul_kernel(a_ref, b_ref, scale_ref, shift_ref, *rest, relu, has_res):
    if has_res:
        res_ref, o_ref, acc_ref = rest
    else:
        o_ref, acc_ref = rest

    @pl.when(pl.program_id(2) == 0)
    def _():
        acc_ref[...] = jnp.zeros_like(acc_ref)

    acc_ref[...] += jnp.dot(a_ref[...], b_ref[...],
                            preferred_element_type=jnp.float32)

    @pl.when(pl.program_id(2) == pl.num_programs(2) - 1)
    def _():
        out = acc_ref[...] * scale_ref[...] + shift_ref[...]
        if has_res:
            out = out + res_ref[...].astype(jnp.float32)
        if relu:
            out = jnp.maximum(out, 0.0)
        o_ref[...] = out.astype(o_ref.dtype)


def pl_matmul(a, w_pad, scale_p, shift_p, relu=False, residual=None,
              out_dtype=jnp.bfloat16):
    """relu_opt((a @ w_pad) * scale + shift [+ residual]) -> out_dtype.

    a: (M, K) (bf16 preferred; cast is a no-op then); w_pad: (Kp, Np) bf16
    pre-padded at init; scale_p / shift_p: (1, Np) fp32; residual: (M, <=Np)
    bf16.  Returns (M, Np) out_dtype.
    """
    M, K = a.shape
    Kp, Np = w_pad.shape

    if M >= 1024:
        tm = 512
    elif M >= 256:
        tm = 128
    else:
        tm = _ceil_to(M, 16)          # bf16 packs 16 rows / sublane group
    Mp = _ceil_to(M, tm)
    tn = _pick_tile(Np)
    tk = _pick_tile(Kp)

    a_p = jnp.pad(a.astype(jnp.bfloat16), ((0, Mp - M), (0, Kp - K)))

    in_specs = [
        pl.BlockSpec((tm, tk), lambda i, j, k: (i, k)),
        pl.BlockSpec((tk, tn), lambda i, j, k: (k, j)),
        pl.BlockSpec((1, tn), lambda i, j, k: (0, j)),
        pl.BlockSpec((1, tn), lambda i, j, k: (0, j)),
    ]
    args = [a_p, w_pad, scale_p, shift_p]
    has_res = residual is not None
    if has_res:
        rM, rN = residual.shape
        res_p = jnp.pad(residual.astype(jnp.bfloat16),
                        ((0, Mp - rM), (0, Np - rN)))
        in_specs.append(pl.BlockSpec((tm, tn), lambda i, j, k: (i, j)))
        args.append(res_p)

    out = pl.pallas_call(
        functools.partial(_matmul_kernel, relu=relu, has_res=has_res),
        out_shape=jax.ShapeDtypeStruct((Mp, Np), out_dtype),
        grid_spec=pltpu.PrefetchScalarGridSpec(
            num_scalar_prefetch=0,
            grid=(Mp // tm, Np // tn, Kp // tk),
            in_specs=in_specs,
            out_specs=pl.BlockSpec((tm, tn), lambda i, j, k: (i, j)),
            scratch_shapes=[pltpu.VMEM((tm, tn), jnp.float32)],
        ),
        compiler_params=pltpu.CompilerParams(
            dimension_semantics=("parallel", "parallel", "arbitrary")),
    )(*args)
    return out[:M]


# --------------------------------------------------------------------------- #
# Kernel 2: recurrent LSTM core for one (layer, direction).
#   Input-projection gates (x @ W_ih + b) are precomputed with pl_matmul and
#   fed per-timestep; only W_hh (~8 MiB bf16) is DMA'd into VMEM at t == 0 and
#   stays resident while time runs as an "arbitrary" grid axis.
# --------------------------------------------------------------------------- #
def _lstm_rec_kernel(gx_ref, whh_hbm, h_out_ref, whh_v, h_sc, c_sc, dma_sem):
    t = pl.program_id(0)

    @pl.when(t == 0)
    def _():
        cp = pltpu.make_async_copy(whh_hbm, whh_v, dma_sem.at[0])
        cp.start()
        cp.wait()
        h_sc[...] = jnp.zeros_like(h_sc)
        c_sc[...] = jnp.zeros_like(c_sc)

    h_prev = h_sc[...].astype(jnp.bfloat16)            # (Bp, HPAD)
    nk_h = HPAD // _KC

    def gate_pre(g):                                   # PyTorch order i, f, g, o
        return (gx_ref[0, :, g * HPAD:(g + 1) * HPAD].astype(jnp.float32)
                + _dot_k_chunks_stacked(h_prev, whh_v, g * nk_h))

    # Consume each gate as produced (<= 2 gate accumulators live at a time).
    c_new = jax.nn.sigmoid(gate_pre(1)) * c_sc[...]                 # forget
    c_new = c_new + jax.nn.sigmoid(gate_pre(0)) * jnp.tanh(gate_pre(2))
    h_new = jax.nn.sigmoid(gate_pre(3)) * jnp.tanh(c_new)           # output

    c_sc[...] = c_new
    h_sc[...] = h_new
    h_out_ref[0] = h_new.astype(jnp.bfloat16)


def pl_lstm_layer(seq, p, reverse):
    """seq: (T, Bp, In_pad) bf16; p = {'w_ih','w_hh','b','scale1'}.
    Returns (T, Bp, HPAD) bf16 hidden states (time-ordered, even if reverse)."""
    T, Bp, In_pad = seq.shape

    # Hoisted input projection for all timesteps / gates: (T*Bp, 4*HPAD) bf16,
    # bias folded in via the matmul's shift epilogue.
    gx = pl_matmul(seq.reshape(T * Bp, In_pad), p['w_ih'],
                   p['scale1'], p['b'], relu=False)
    gx = gx.reshape(T, Bp, 4 * HPAD)

    if reverse:
        tmap = lambda t: (T - 1 - t, 0, 0)
    else:
        tmap = lambda t: (t, 0, 0)

    return pl.pallas_call(
        _lstm_rec_kernel,
        out_shape=jax.ShapeDtypeStruct((T, Bp, HPAD), jnp.bfloat16),
        grid_spec=pltpu.PrefetchScalarGridSpec(
            num_scalar_prefetch=0,
            grid=(T,),
            in_specs=[
                pl.BlockSpec((1, Bp, 4 * HPAD), tmap),
                pl.BlockSpec(memory_space=pl.ANY),     # W_hh stays in HBM
            ],
            out_specs=pl.BlockSpec((1, Bp, HPAD), tmap),
            scratch_shapes=[
                pltpu.VMEM(p['w_hh'].shape, jnp.bfloat16),  # resident W_hh
                pltpu.VMEM((Bp, HPAD), jnp.float32),        # h state
                pltpu.VMEM((Bp, HPAD), jnp.float32),        # c state
                pltpu.SemaphoreType.DMA((1,)),
            ],
        ),
        compiler_params=pltpu.CompilerParams(
            dimension_semantics=("arbitrary",),
            vmem_limit_bytes=24 * 1024 * 1024),
    )(gx, p['w_hh'])


# --------------------------------------------------------------------------- #
# Kernel 3: fused classifier Linear->ReLU->Linear->ReLU->Linear (Dropout = id).
# No grid: whole weights resident in VMEM, single-buffered.
# --------------------------------------------------------------------------- #
def _classifier_kernel(x_ref, w1_ref, b1_ref, w2_ref, b2_ref, w3_ref, b3_ref,
                       o_ref):
    h = _dot_k_chunks_2d(x_ref[...].astype(jnp.bfloat16), w1_ref) + b1_ref[...]
    h = jnp.maximum(h, 0.0)
    h = _dot_k_chunks_2d(h.astype(jnp.bfloat16), w2_ref) + b2_ref[...]
    h = jnp.maximum(h, 0.0)
    o_ref[...] = _dot_k_chunks_2d(h.astype(jnp.bfloat16), w3_ref) + b3_ref[...]


def pl_classifier(x, cw):
    R, D = x.shape
    Rp = _ceil_to(R, 16)
    x_p = jnp.pad(x.astype(jnp.bfloat16), ((0, Rp - R), (0, 0)))
    n_out = cw['w3'].shape[1]

    out = pl.pallas_call(
        _classifier_kernel,
        out_shape=jax.ShapeDtypeStruct((Rp, n_out), jnp.float32),
        compiler_params=pltpu.CompilerParams(
            vmem_limit_bytes=32 * 1024 * 1024),
    )(x_p, cw['w1'], cw['b1'], cw['w2'], cw['b2'], cw['w3'], cw['b3'])
    return out[:R, :2]


# --------------------------------------------------------------------------- #
# Glue: im2col convolution (bf16 patches), fused max-pool tree, ResNet blocks.
# --------------------------------------------------------------------------- #
def conv2d_bn(x, cw, kh, kw, stride, pad, relu, residual=None):
    """x: (N,H,W,Cin) NHWC bf16; cw: {'w','scale','shift','cout'} pre-padded.
    BN folded into scale/shift; optional fused residual add before ReLU."""
    N, H, W, Cin = x.shape
    Ho = (H + 2 * pad - kh) // stride + 1
    Wo = (W + 2 * pad - kw) // stride + 1
    xp = jnp.pad(x, ((0, 0), (pad, pad), (pad, pad), (0, 0)))
    patches = []
    for dh in range(kh):
        for dw in range(kw):
            patches.append(
                xp[:, dh:dh + stride * Ho:stride, dw:dw + stride * Wo:stride, :])
    a = jnp.concatenate(patches, axis=-1).reshape(N * Ho * Wo, kh * kw * Cin)
    res_flat = None
    if residual is not None:
        res_flat = residual.reshape(N * Ho * Wo, cw['cout'])
    out = pl_matmul(a, cw['w'], cw['scale'], cw['shift'], relu=relu,
                    residual=res_flat)
    return out[:, :cw['cout']].reshape(N, Ho, Wo, cw['cout'])


@jax.jit
def maxpool_3x3_s2(x):
    """3x3/s2/p1 max-pool as a fused jnp.maximum tree (XLA fuses the shifted
    strided slices — no 9x HBM materialization)."""
    N, H, W, C = x.shape
    Ho = (H + 2 - 3) // 2 + 1
    Wo = (W + 2 - 3) // 2 + 1
    xp = jnp.pad(x, ((0, 0), (1, 1), (1, 1), (0, 0)),
                 constant_values=-jnp.inf)
    out = None
    for dh in range(3):
        for dw in range(3):
            v = xp[:, dh:dh + 2 * Ho:2, dw:dw + 2 * Wo:2, :]
            out = v if out is None else jnp.maximum(out, v)
    return out


def basic_block(x, blk):
    s = blk['stride']
    out = conv2d_bn(x, blk['conv1'], 3, 3, s, 1, relu=True)
    if blk['down'] is not None:
        identity = conv2d_bn(x, blk['down'], 1, 1, s, 0, relu=False)
    else:
        identity = x
    # second conv: BN + residual add + ReLU fused into the matmul epilogue
    return conv2d_bn(out, blk['conv2'], 3, 3, 1, 1, relu=True,
                     residual=identity)


def resnet34_backbone(x, rp):
    y = conv2d_bn(x, rp['conv1'], 7, 7, 2, 3, relu=True)
    y = maxpool_3x3_s2(y)
    for blocks in rp['layers']:
        for blk in blocks:
            y = basic_block(y, blk)
    # AdaptiveAvgPool2d((1,1)) — fp32-accumulated spatial mean, host-side glue
    return jnp.mean(y, axis=(1, 2), dtype=jnp.float32).astype(jnp.bfloat16)


def res_lstm_forward(x, params):
    """x: (B, T, C, H, W) float32 (PyTorch NCHW per frame) -> (B, T, 2)."""
    B, T, C, H, W = x.shape
    xf = x.reshape(B * T, C, H, W).transpose(0, 2, 3, 1).astype(jnp.bfloat16)

    feat = resnet34_backbone(xf, params['resnet'])       # (B*T, 512) bf16

    Bp = _ceil_to(B, 16)
    seq = feat.reshape(B, T, 512).transpose(1, 0, 2)     # (T, B, 512)
    seq = jnp.pad(seq, ((0, 0), (0, Bp - B), (0, 0)))    # (T, Bp, 512) bf16

    for layer in params['lstm']:
        fwd = pl_lstm_layer(seq, layer[0], reverse=False)    # (T, Bp, HPAD) bf16
        bwd = pl_lstm_layer(seq, layer[1], reverse=True)
        seq = jnp.concatenate([fwd, bwd], axis=-1)           # (T, Bp, 2*HPAD) bf16

    cls_in = seq[:, :B, :].transpose(1, 0, 2).reshape(B * T, 2 * HPAD)
    pred = pl_classifier(cls_in, params['cls'])              # (B*T, 2) f32
    return pred.reshape(B, T, 2)


# --------------------------------------------------------------------------- #
# Deterministic parameter initialization (synthetic — no checkpoint loading).
# Weights are padded / laid out / cast to bf16 once here, not per call.
# --------------------------------------------------------------------------- #
def _bn_fold(key, c):
    cp = _ceil_to(c, 128)
    k1, k2, k3, k4 = jax.random.split(key, 4)
    gamma = 1.0 + 0.1 * jax.random.normal(k1, (c,), jnp.float32)
    beta = 0.1 * jax.random.normal(k2, (c,), jnp.float32)
    mean = 0.1 * jax.random.normal(k3, (c,), jnp.float32)
    var = 1.0 + 0.1 * jax.random.uniform(k4, (c,), jnp.float32)
    scale = gamma / jnp.sqrt(var + 1e-5)
    shift = beta - mean * scale
    scale = jnp.pad(scale, (0, cp - c), constant_values=1.0).reshape(1, cp)
    shift = jnp.pad(shift, (0, cp - c)).reshape(1, cp)
    return scale, shift


def _conv_entry(kw_key, bn_key, kh, kwid, cin, cout):
    K = kh * kwid * cin
    Kp, Np = _ceil_to(K, 128), _ceil_to(cout, 128)
    w = jax.random.normal(kw_key, (K, cout), jnp.float32) / np.sqrt(K)
    w = jnp.pad(w, ((0, Kp - K), (0, Np - cout))).astype(jnp.bfloat16)
    scale, shift = _bn_fold(bn_key, cout)
    return {'w': w, 'scale': scale, 'shift': shift, 'cout': cout}


def init_resnet_params(key):
    keys = iter(jax.random.split(key, 160))
    p = {'conv1': _conv_entry(next(keys), next(keys), 7, 7, 1, 64)}
    layers = []
    in_c = 64
    for out_c, n_blocks, stride in [(64, 3, 1), (128, 4, 2),
                                    (256, 6, 2), (512, 3, 2)]:
        blocks = []
        for b in range(n_blocks):
            s = stride if b == 0 else 1
            blk = {'conv1': _conv_entry(next(keys), next(keys), 3, 3, in_c, out_c),
                   'conv2': _conv_entry(next(keys), next(keys), 3, 3, out_c, out_c),
                   'down': (_conv_entry(next(keys), next(keys), 1, 1, in_c, out_c)
                            if (s != 1 or in_c != out_c) else None),
                   'stride': s}
            blocks.append(blk)
            in_c = out_c
        layers.append(blocks)
    p['layers'] = layers
    return p


def _gate_pad_cols(w):
    """(rows, 4*HID) -> (rows, 4, HPAD); gate pad columns are zero so padded
    hidden lanes stay exactly zero through the recurrence."""
    w = w.reshape(w.shape[0], 4, HID)
    return jnp.pad(w, ((0, 0), (0, 0), (0, HPAD - HID)))


def _init_lstm_dir(key, in_true, first_layer):
    k1, k2, k3, k4 = jax.random.split(key, 4)
    bound = 1.0 / np.sqrt(HID)
    w_ih = jax.random.uniform(k1, (in_true, 4 * HID), jnp.float32, -bound, bound)
    w_hh = jax.random.uniform(k2, (HID, 4 * HID), jnp.float32, -bound, bound)
    b = (jax.random.uniform(k3, (4 * HID,), jnp.float32, -bound, bound)
         + jax.random.uniform(k4, (4 * HID,), jnp.float32, -bound, bound))

    w_ih = _gate_pad_cols(w_ih)                        # (in_true, 4, HPAD)
    w_hh = _gate_pad_cols(w_hh)                        # (HID, 4, HPAD)

    if first_layer:                                    # input = 512 ResNet feats
        w_ih_p = w_ih
    else:   # input = concat(fwd, bwd), each padded HID -> HPAD with zeros
        z = jnp.zeros((HPAD - HID, 4, HPAD), jnp.float32)
        w_ih_p = jnp.concatenate([w_ih[:HID], z, w_ih[HID:], z], axis=0)
    in_pad = w_ih_p.shape[0]

    # Hoisted input projection weight: (In_pad, 4*HPAD) bf16 (gates on N axis).
    w_ih_2d = w_ih_p.reshape(in_pad, 4 * HPAD).astype(jnp.bfloat16)

    # Recurrent weight, chunked on K for resident in-kernel dots:
    # (4*HPAD/_KC, _KC, HPAD) bf16 (gate-major chunk order).
    w_hh_p = jnp.pad(w_hh, ((0, HPAD - HID), (0, 0), (0, 0)))       # (HPAD,4,HPAD)
    w_hh_t = jnp.transpose(w_hh_p, (1, 0, 2)).astype(jnp.bfloat16)  # (4,HPAD,HPAD)
    w_hh_c = w_hh_t.reshape(4 * (HPAD // _KC), _KC, HPAD)

    b_p = jnp.pad(b.reshape(4, HID), ((0, 0), (0, HPAD - HID)))
    b_row = b_p.reshape(1, 4 * HPAD).astype(jnp.float32)
    ones = jnp.ones((1, 4 * HPAD), jnp.float32)
    return {'w_ih': w_ih_2d, 'w_hh': w_hh_c, 'b': b_row, 'scale1': ones}


def init_lstm_params(key, input_size=512, num_layers=3):
    keys = jax.random.split(key, num_layers * 2)
    params = []
    for layer in range(num_layers):
        in_true = input_size if layer == 0 else 2 * HID
        dirs = [_init_lstm_dir(keys[2 * layer + d], in_true, layer == 0)
                for d in range(2)]
        params.append(dirs)
    return params


def init_classifier_params(key):
    ks = jax.random.split(key, 6)

    def lin(kw_key, kb_key, fi, fo, fo_pad, scatter=False):
        bound = 1.0 / np.sqrt(fi)
        w = jax.random.uniform(kw_key, (fi, fo), jnp.float32, -bound, bound)
        b = jax.random.uniform(kb_key, (fo,), jnp.float32, -bound, bound)
        if scatter:   # rows follow the padded concat(fwd, bwd) LSTM layout
            z = jnp.zeros((HPAD - HID, fo), jnp.float32)
            w = jnp.concatenate([w[:HID], z, w[HID:], z], axis=0)
        w = jnp.pad(w, ((0, 0), (0, fo_pad - fo))).astype(jnp.bfloat16)
        b = jnp.pad(b, (0, fo_pad - fo)).reshape(1, fo_pad).astype(jnp.float32)
        return w, b

    w1, b1 = lin(ks[0], ks[1], 2 * HID, 1024, 1024, scatter=True)
    w2, b2 = lin(ks[2], ks[3], 1024, 1024, 1024)
    w3, b3 = lin(ks[4], ks[5], 1024, 2, 128)
    return {'w1': w1, 'b1': b1, 'w2': w2, 'b2': b2, 'w3': w3, 'b3': b3}


if __name__ == "__main__":
    master = jax.random.PRNGKey(0)
    k_res, k_lstm, k_cls, k_x = jax.random.split(master, 4)

    params = {'resnet': init_resnet_params(k_res),
              'lstm': init_lstm_params(k_lstm),
              'cls': init_classifier_params(k_cls)}

    # Small example input: batch=2, seq=3, 1 channel (module forces 1-ch conv1),
    # 32x32 spatial (the backbone reduces it to 1x1 -> 512-dim feature/frame).
    B, T, C, H, W = 2, 3, 1, 32, 32
    x = jax.random.normal(k_x, (B, T, C, H, W), jnp.float32)

    pred = res_lstm_forward(x, params)
    pred = jax.block_until_ready(pred)
    assert pred.shape == (B, T, 2), pred.shape
    assert bool(jnp.all(jnp.isfinite(pred)))
    print("KERNEL_OK")
</pallas_src>

<mosaic_0001>
module attributes {stable_mosaic.version = 11 : i64} {
  func.func @_matmul_kernel(%arg0: i32, %arg1: i32, %arg2: i32, %arg3: memref<512x128xbf16, #tpu.memory_space<vmem>>, %arg4: memref<128x128xbf16, #tpu.memory_space<vmem>>, %arg5: memref<1x128xf32, #tpu.memory_space<vmem>>, %arg6: memref<1x128xf32, #tpu.memory_space<vmem>>, %arg7: memref<512x128xbf16, #tpu.memory_space<vmem>>, %arg8: memref<512x128xf32, #tpu.memory_space<vmem>>) attributes {dimension_semantics = [#tpu.dimension_semantics<parallel>, #tpu.dimension_semantics<parallel>, #tpu.dimension_semantics<arbitrary>], iteration_bounds = array<i64: 3, 1, 1>, scalar_prefetch = 0 : i64, scratch_operands = 1 : i64, tpu.core_type = #tpu.core_type<tc>, window_params = [{transform_indices = @transform_0, window_bounds = array<i64: 512, 128>}, {transform_indices = @transform_1, window_bounds = array<i64: 128, 128>}, {transform_indices = @transform_2, window_bounds = array<i64: 1, 128>}, {transform_indices = @transform_3, window_bounds = array<i64: 1, 128>}, {transform_indices = @transform_4, window_bounds = array<i64: 512, 128>}]} {
    %c0_i32 = arith.constant 0 : i32
    %0 = arith.cmpi eq, %arg2, %c0_i32 : i32
    %1 = arith.extui %0 : i1 to i32
    %c0_i32_0 = arith.constant 0 : i32
    %2 = arith.cmpi ne, %1, %c0_i32_0 : i32
    scf.if %2 {
      %cst_10 = arith.constant 0.000000e+00 : f32
      %12 = vector.broadcast %cst_10 : f32 to vector<512x128xf32>
      %c0_11 = arith.constant 0 : index
      %c0_12 = arith.constant 0 : index
      %13 = vector.load %arg8[%c0_11, %c0_12] : memref<512x128xf32, #tpu.memory_space<vmem>>, vector<512x128xf32>
      tpu.vector_store %arg8[%c0_11, %c0_12], %12 {strides = array<i32>} : memref<512x128xf32, #tpu.memory_space<vmem>>, vector<512x128xf32>,
    } else {
    }
    %c0 = arith.constant 0 : index
    %c0_1 = arith.constant 0 : index
    %3 = vector.load %arg8[%c0, %c0_1] : memref<512x128xf32, #tpu.memory_space<vmem>>, vector<512x128xf32>
    %c0_2 = arith.constant 0 : index
    %c0_3 = arith.constant 0 : index
    %4 = vector.load %arg3[%c0_2, %c0_3] : memref<512x128xbf16, #tpu.memory_space<vmem>>, vector<512x128xbf16>
    %c0_4 = arith.constant 0 : index
    %c0_5 = arith.constant 0 : index
    %5 = vector.load %arg4[%c0_4, %c0_5] : memref<128x128xbf16, #tpu.memory_space<vmem>>, vector<128x128xbf16>
    %cst = arith.constant dense<0.000000e+00> : vector<512x128xf32>
    %6 = tpu.matmul %4, %5, %cst {dimension_numbers = #tpu.dot_dimension_numbers<[1], [0], [0], [1], [0, 0, 1, 1], [], []>} : vector<512x128xbf16>, vector<128x128xbf16>, vector<512x128xf32> -> vector<512x128xf32>
    %7 = arith.addf %3, %6 : vector<512x128xf32>
    %c0_6 = arith.constant 0 : index
    %c0_7 = arith.constant 0 : index
    %8 = vector.load %arg8[%c0_6, %c0_7] : memref<512x128xf32, #tpu.memory_space<vmem>>, vector<512x128xf32>
    tpu.vector_store %arg8[%c0_6, %c0_7], %7 {strides = array<i32>} : memref<512x128xf32, #tpu.memory_space<vmem>>, vector<512x128xf32>,
    %c0_i32_8 = arith.constant 0 : i32
    %9 = arith.cmpi eq, %arg2, %c0_i32_8 : i32
    %10 = arith.extui %9 : i1 to i32
    %c0_i32_9 = arith.constant 0 : i32
    %11 = arith.cmpi ne, %10, %c0_i32_9 : i32
    scf.if %11 {
      %c0_10 = arith.constant 0 : index
      %c0_11 = arith.constant 0 : index
      %12 = vector.load %arg8[%c0_10, %c0_11] : memref<512x128xf32, #tpu.memory_space<vmem>>, vector<512x128xf32>
      %c0_12 = arith.constant 0 : index
      %c0_13 = arith.constant 0 : index
      %13 = vector.load %arg5[%c0_12, %c0_13] : memref<1x128xf32, #tpu.memory_space<vmem>>, vector<1x128xf32>
      %14 = vector.broadcast %13 : vector<1x128xf32> to vector<512x128xf32>
      %15 = arith.mulf %12, %14 : vector<512x128xf32>
      %c0_14 = arith.constant 0 : index
      %c0_15 = arith.constant 0 : index
      %16 = vector.load %arg6[%c0_14, %c0_15] : memref<1x128xf32, #tpu.memory_space<vmem>>, vector<1x128xf32>
      %17 = vector.broadcast %16 : vector<1x128xf32> to vector<512x128xf32>
      %18 = arith.addf %15, %17 : vector<512x128xf32>
      %cst_16 = arith.constant 0.000000e+00 : f32
      %19 = vector.broadcast %cst_16 : f32 to vector<512x128xf32>
      %20 = arith.maximumf %18, %19 : vector<512x128xf32>
      %21 = arith.truncf %20 : vector<512x128xf32> to vector<512x128xbf16>
      %c0_17 = arith.constant 0 : index
      %c0_18 = arith.constant 0 : index
      %22 = vector.load %arg7[%c0_17, %c0_18] : memref<512x128xbf16, #tpu.memory_space<vmem>>, vector<512x128xbf16>
      tpu.vector_store %arg7[%c0_17, %c0_18], %21 {strides = array<i32>} : memref<512x128xbf16, #tpu.memory_space<vmem>>, vector<512x128xbf16>,
    } else {
    }
    return
  }
  func.func @transform_0(%arg0: i32, %arg1: i32, %arg2: i32) -> (i32, i32) {
    %c0_i32 = arith.constant 0 : i32
    return %arg0, %arg2 : i32, i32
  }
  func.func @transform_1(%arg0: i32, %arg1: i32, %arg2: i32) -> (i32, i32) {
    %c0_i32 = arith.constant 0 : i32
    return %arg2, %arg1 : i32, i32
  }
  func.func @transform_2(%arg0: i32, %arg1: i32, %arg2: i32) -> (i32, i32) {
    %c0_i32 = arith.constant 0 : i32
    %c0_i32_0 = arith.constant 0 : i32
    return %c0_i32, %arg1 : i32, i32
  }
  func.func @transform_3(%arg0: i32, %arg1: i32, %arg2: i32) -> (i32, i32) {
    %c0_i32 = arith.constant 0 : i32
    %c0_i32_0 = arith.constant 0 : i32
    return %c0_i32, %arg1 : i32, i32
  }
  func.func @transform_4(%arg0: i32, %arg1: i32, %arg2: i32) -> (i32, i32) {
    %c0_i32 = arith.constant 0 : i32
    return %arg0, %arg1 : i32, i32
  }
}

</mosaic_0001>

<bundles_post_ra>
// kernel: tpu_custom_call.1
= control target key start
LH: loop header
LB: loop body
LE: loop exit
PB: predicated region body
PF: predicated region fallthrough
CT: control target
= control target key end

     0   :  { %9 = vsyncpa [#allocation4], 0  ;;  %s3148_s0 = inlined_call_operand.hbm [shape: bf16[1536,128], index: 0, kind: input, shape index: {}]   ;;  %s3149_s1 = inlined_call_operand.hbm [shape: bf16[128,128], index: 1, kind: input, shape index: {}]   ;;  %s3150_s2 = inlined_call_operand.vmem [shape: f32[1,128], index: 2, kind: input, shape index: {}]   ;;  %s3151_s3 = inlined_call_operand.vmem [shape: f32[1,128], index: 3, kind: input, shape index: {}]   ;;  %s3152_s4 = inlined_call_operand.hbm [shape: bf16[1536,128], index: 4, kind: output, shape index: {}]  }
   0x1   :  { %11 = vsyncpa [#allocation4 + $0x1], 0 }
   0x2   :  { %12 = vsyncpa [#allocation7], 0 }
   0x3   :  { %13 = vsyncpa [#allocation5], 0 }
   0x4   :  { %15 = vsyncpa [#allocation5 + $0x1], 0  ;;  %s2714_s15 = smov 0   ;;  %s2716_s16 = smov 0  }
   0x5   :  { %s2718_s17 = smov 0   ;;  %s2720_s18 = smov 0  }
   0x6   :  { %s2722_s19 = smov 0   ;;  %s2724_s20 = smov 0  }
   0x7 LB: > { %s1901_s21 = sadd.s32 4294967295, %s2680_s20   ;;  %s1902_s22 = sadd.s32 4294967294, %s2680_s20   ;;  %s2680_s20 = sphi %s2724_s20, %s21_s20   ;;  %s2676_s19 = sphi %s2722_s19, %s3175_s19   ;;  %s2672_s18 = sphi %s2720_s18, %s3174_s18   ;;  %s2668_s17 = sphi %s2718_s17, %s3173_s17   ;;  %s2664_s16 = sphi %s2716_s16, %s3172_s16   ;;  %s2660_s15 = sphi %s2714_s15, %s3171_s15  }
   0x8   : > { %p62_p0 = scmp.ne.s32.totalorder %s2664_s16, %s2660_s15  ;;  %p2748_p1 = scmp.eq.s32.totalorder %s1901_s21, 0 }
   0x9   : > { %p2752_p2 = scmp.eq.s32.totalorder %s1901_s21, 2  ;;  %p174_p3 = scmp.eq.s32.totalorder %s1902_s22, 2 }
   0xa   : > { %s3157_s23 = scalar_select %p2748_p1, 1, 0 }
   0xb   : > { %s3158_s24 = scalar_select %p2752_p2, 1, 0 }
   0xc   : > { %p2758_p4 = por %p2748_p1, %p62_p0  ;;  %p1903_p5 = scmp.ge.s32.totalorder %s2680_s20, 1 }
   0xd   : > { %p2763_p6 = por %p174_p3, %p62_p0  ;;  %p181_p7 = scmp.lt.s32.totalorder %s2680_s20, 4 }
   0xe   : > { %s3159_s25 = scalar_select %p2758_p4, 1, 0 }
   0xf   : > { %s3160_s26 = scalar_select %p2763_p6, 1, 0 }
  0x10   : > { %p2768_p8 = pnand %p1903_p5, %p181_p7  ;;  %s2682_s28 = smov [#allocation6]  }
  0x11   : > { %s197_s29 = sshll.u32 %s2682_s28, 4  ;;  %s40_s5 = sadd.s32 1, %s2676_s19  ;;  %s198_s29 = int_to_ptr.vmem [resolvable:$true] %s197_s29 }
  0x12   : > { %s3161_s27 = scalar_select %p2768_p8, 1, 0 }
  0x13   : > { %p2427_p9 = pneg %p2768_p8  ;;  %s2536_s8 = scalar_lea.hbm %s3149_s1, 1024 }
  0x14   : > { %p2537_p11 = scmp.ne.s32.totalorder %s3149_s1, %s2536_s8  ;;  %p2543_p3 = scmp.lt.u32.totalorder %s2536_s8, %s3149_s1 }
  0x15   : > { %p2776_p10 = pnand %p2427_p9, %p2748_p1 }
  0x17   : > { %p2538_p12 = pneg %p2776_p10 }
  0x19   : > { %p2539_p13 = pnand %p2538_p12, %p2537_p11 }
  0x1b   : > { %p2540_p0 = pneg %p2539_p13 }
  0x1d   : > { %p2545_p5 = pnand %p2543_p3, %p2540_p0 }
  0x1f   : > { %2548 = shalt.err (!%p2545_p5)
}
  0x20   : > { %s2549_s13 = scalar_lea.vmem %s198_s29, 1024  ;;  %p2557_p1 = scmp.lt.s32.totalorder %s198_s29, %s198_s29 }
  0x21   : > { %p2550_p7 = scmp.ne.s32.totalorder %s198_s29, %s2549_s13  ;;  %p2558_p4 = scmp.lt.s32.totalorder %s2549_s13, %s2549_s13 }
  0x23   : > { %p2552_p9 = pnand %p2550_p7, %p2538_p12  ;;  %p2559_p8 = por %p2558_p4, %p2557_p1 }
  0x25   : > { %p2553_p6 = pneg %p2552_p9 }
  0x27   : > { %p2560_p2 = pnand %p2559_p8, %p2553_p6 }
  0x29   : > { %2563 = shalt.err (!%p2560_p2)
}
  0x2a   : > { %s2683_s14 = smov 64   ;;  %s2684_s21 = smov 4  }
  0x2b   : > { %2430 = dma.hbm_to_vmem [thread:$0]  (!%p2776_p10), %s3149_s1, 1024, %s198_s29, [#allocation7], %s2683_s14, %s2683_s14, %s2684_s21  }
  0x2c   : > { %p42_p1 = scmp.ge.s32.totalorder %s40_s5, 3  ;;  %s49_s6 = sadd.s32 1, %s2668_s17 }
  0x2d   : > { %p56_p2 = scmp.ne.s32.totalorder %s2668_s17, %s2664_s16  ;;  %p57_p4 = scmp.eq.s32.totalorder %s2680_s20, 0 }
  0x2e   : > { %s3177_s5 = smov (%p42_p1, %s40_s5), 0  ;;  %p3164_p8 = scmp.ne.s32.totalorder %s3158_s24, 0 }
  0x2f   : > { %p2806_p6 = por %p57_p4, %p56_p2  ;;  %s44_s8 = ssub.s32 %s2676_s19, %s3177_s5 }
  0x30   : > { %p2812_p11 = por %p3164_p8, %p56_p2  ;;  %p2440_p12 = scmp.lt.s32.totalorder %s2680_s20, 3 }
  0x31   : > { %p47_p10 = scmp.eq.s32.totalorder %s44_s8, 0  ;;  %s223_s29 = sand.u32 1, %s2668_s17  }
  0x32   : > { %s1908_s9 = sshll.u32 %s223_s29, 8  ;;  %s2026_s11 = sshll.u32 %s2676_s19, 12 }
  0x33   : > { %s2821_s10 = scalar_select %p47_p10, %s2668_s17, %s49_s6  }
  0x34   : > { %s2827_s22 = scalar_lea.hbm %s3148_s0, %s2026_s11  ;;  %s227_s24 = scalar_lea.vmem [#allocation3], %s1908_s9 }
  0x35   : > { %s235_s28 = sshll.u32 %s227_s24, 4  ;;  %p2833_p13 = pnand %p2440_p12, %p2806_p6  ;;  %s2829_s28 = int_to_ptr.vmem [resolvable:$true] %s235_s28 }
  0x36   : > { %s2837_s6 = scalar_lea.sflag [#allocation4], %s223_s29  ;;  %s2564_s12 = scalar_lea.hbm %s2827_s22, 4096 }
  0x37   : > { %p2565_p0 = scmp.ne.s32.totalorder %s2827_s22, %s2564_s12  ;;  %p2566_p3 = pneg %p2833_p13 }
  0x38   : > { %s2569_s7 = scalar_lea.hbm %s3148_s0, 12288  ;;  %p2570_p9 = scmp.lt.u32.totalorder %s2827_s22, %s3148_s0 }
  0x39   : > { %p2567_p5 = pnand %p2566_p3, %p2565_p0  ;;  %p2571_p1 = scmp.lt.u32.totalorder %s2569_s7, %s2564_s12 }
  0x3a   : > { %p2573_p4 = scmp.lt.u32.totalorder %s2564_s12, %s2827_s22 }
  0x3b   : > { %p2568_p7 = pneg %p2567_p5  ;;  %p2572_p2 = por %p2571_p1, %p2570_p9 }
  0x3d   : > { %p2574_p6 = por %p2573_p4, %p2572_p2 }
  0x3f   : > { %p2575_p8 = pnand %p2574_p6, %p2568_p7 }
  0x41   : > { %2578 = shalt.err (!%p2575_p8)
}
  0x42   : > { %s2579_s29 = scalar_lea.vmem %s2829_s28, 4096  ;;  %s2685_s9 = smov [#allocation3]  }
  0x43   : > { %p2580_p12 = scmp.ne.s32.totalorder %s2829_s28, %s2579_s29  ;;  %s2584_s11 = sshll.u32 %s2685_s9, 4  ;;  %s2585_s11 = int_to_ptr.vmem [resolvable:$false] %s2584_s11 }
  0x44   : > { %s2586_s13 = scalar_lea.vmem %s2585_s11, 8192  ;;  %p2587_p5 = scmp.lt.s32.totalorder %s2829_s28, %s2585_s11 }
  0x45   : > { %p2582_p10 = pnand %p2580_p12, %p2566_p3  ;;  %p2588_p9 = scmp.lt.s32.totalorder %s2586_s13, %s2579_s29 }
  0x47   : > { %p2583_p0 = pneg %p2582_p10  ;;  %p2589_p1 = por %p2588_p9, %p2587_p5 }
  0x49   : > { %p2590_p2 = pnand %p2589_p1, %p2583_p0 }
  0x4b   : > { %2593 = shalt.err (!%p2590_p2)
}
  0x4c   : > { %2434 = dma.hbm_to_vmem [thread:$0]  (!%p2833_p13), %s2827_s22, 4096, %s2829_s28, %s2837_s6, %s2683_s14, %s2683_s14, %s2684_s21  }
  0x4d   : > { %p3167_p3 = scmp.ne.s32.totalorder %s3161_s27, 0 }
  0x4e   : > { %s2871_s12 = sand.u32 (!%p3167_p3), 1, %s2664_s16   ;;  %p3168_p7 = scmp.ne.s32.totalorder (!%p3167_p3), %s3159_s25, 0 }
  0x4f   : > { %247 = sbr.rel (%p3167_p3) target bundleno = 418 (0x1a2), region = 36  ;;  %s1912_s7 = sshll.u32 (!%p3167_p3), %s2871_s12, 8 }
  0x50   : > { %s250_s24 = scalar_lea.sflag (!%p3167_p3), [#allocation4], %s2871_s12  ;;  %s2877_s8 = scalar_lea.vmem (!%p3167_p3), [#allocation3], %s1912_s7 }
  0x56   : > { %2647 = dma.done.wait (%p3168_p7), %s250_s24, 4096  }
  0x57   : > { %2649 = vsyncadd (%p3168_p7), %s250_s24, 4294963200  ;;  %p3169_p13 = scmp.ne.s32.totalorder %s3157_s23, 0 }
  0x59   : > { %2651 = dma.done.wait (%p3169_p13), [#allocation7], 1024  }
  0x5a   : > { %2653 = vsyncadd (%p3169_p13), [#allocation7], 4294966272  ;;  %v2496_v0 = vld [vmem:[#allocation6] sm:$0xff]   ;;  %v2497_v1 = vld [vmem:[#allocation6 + $0x8] sm:$0xff]   ;;  %s2951_s21 = scalar_lea.vmem [#allocation8], %s1912_s7  ;;  %s2091_s22 = sshll.u32 %s2672_s18, 12 }
  0x5b   : > { %2323 = vmatprep.subr.bf16.mxu0 %v2496_v0  ;;  %2403 = vmatprep.subr.bf16.mxu1 %v2496_v0  ;;  %v2498_v2 = vld [vmem:[#allocation6 + $0x10] sm:$0xff]   ;;  %v2499_v3 = vld [vmem:[#allocation6 + $0x18] sm:$0xff]   ;;  %v2504_v4 = vld [vmem:[%s2877_s8] sm:$0xff]   ;;  %s1775_s28 = sshll.u32 %s2951_s21, 4  ;;  %s3094_s18 = scalar_lea.hbm %s3152_s4, %s2091_s22  ;;  %s3096_s28 = int_to_ptr.vmem [resolvable:$true] %s1775_s28 }
  0x5c   : > { %2324 = vmatpush3.bf16.msra.mxu0 %v2496_v0  ;;  %2411 = vmatpush3.bf16.msra.mxu1 %v2496_v0  ;;  %v2505_v5 = vld [vmem:[%s2877_s8 + $0x80] sm:$0xff]   ;;  %v2501_v7 = vld [vmem:[#allocation6 + $0x28] sm:$0xff]   ;;  %v2502_v8 = vld [vmem:[#allocation6 + $0x30] sm:$0xff]   ;;  %s1761_s9 = scalar_lea.sflag [#allocation5], %s2871_s12  ;;  %s2594_s11 = scalar_lea.vmem %s3096_s28, 4096 }
  0x5d   : > { %2325 = vmatprep.subr.bf16.mxu0 %v2497_v1  ;;  %2404 = vmatprep.subr.bf16.mxu1 %v2497_v1  ;;  %v2500_v6 = vld [vmem:[#allocation6 + $0x20] sm:$0xff]   ;;  %v2503_v9 = vld [vmem:[#allocation6 + $0x38] sm:$0xff]   ;;  %v2506_v10 = vld [vmem:[%s2877_s8 + $0x8] sm:$0xff]   ;;  %p2595_p4 = scmp.ne.s32.totalorder %s3096_s28, %s2594_s11  ;;  %s2686_s13 = smov [#allocation8]  }
  0x5e   : > { %2339 = vmatprep.mubr.bf16.mxu0 %v2504_v4  ;;  %2371 = vmatprep.mubr.bf16.mxu1 %v2505_v5  ;;  %v2507_v11 = vld [vmem:[%s2877_s8 + $0x88] sm:$0xff]   ;;  %v2508_v12 = vld [vmem:[%s2877_s8 + $0x10] sm:$0xff]   ;;  %v2510_v14 = vld [vmem:[%s2877_s8 + $0x18] sm:$0xff]   ;;  %s2598_s7 = sshll.u32 %s2686_s13, 4  ;;  %s2599_s7 = int_to_ptr.vmem [resolvable:$false] %s2598_s7 }
  0x5f   : > { %v2509_v13 = vld [vmem:[%s2877_s8 + $0x90] sm:$0xff]   ;;  %v2511_v15 = vld [vmem:[%s2877_s8 + $0x98] sm:$0xff]   ;;  %v2512_v16 = vld [vmem:[%s2877_s8 + $0x20] sm:$0xff]   ;;  %p2596_p6 = pnand %p2595_p4, %p2812_p11  ;;  %s2600_s24 = scalar_lea.vmem %s2599_s7, 8192 }
  0x60   : > { %2326 = vmatpush3.bf16.msra.mxu0 %v2497_v1  ;;  %2412 = vmatpush3.bf16.msra.mxu1 %v2497_v1  ;;  %v2513_v17 = vld [vmem:[%s2877_s8 + $0xa0] sm:$0xff]   ;;  %v2514_v18 = vld [vmem:[%s2877_s8 + $0x28] sm:$0xff]   ;;  %v2516_v20 = vld [vmem:[%s2877_s8 + $0x30] sm:$0xff]   ;;  %p2601_p12 = scmp.lt.s32.totalorder %s3096_s28, %s2599_s7  ;;  %p2602_p10 = scmp.lt.s32.totalorder %s2600_s24, %s2594_s11 }
  0x61   : > { %2327 = vmatprep.subr.bf16.mxu0 %v2498_v2  ;;  %2405 = vmatprep.subr.bf16.mxu1 %v2498_v2  ;;  %v2515_v19 = vld [vmem:[%s2877_s8 + $0xa8] sm:$0xff]   ;;  %v2517_v21 = vld [vmem:[%s2877_s8 + $0xb0] sm:$0xff]   ;;  %v2518_v22 = vld [vmem:[%s2877_s8 + $0x38] sm:$0xff]   ;;  %p2597_p8 = pneg %p2596_p6 }
  0x62   : > { %v2519_v23 = vld [vmem:[%s2877_s8 + $0xb8] sm:$0xff]   ;;  %v2520_v24 = vld [vmem:[%s2877_s8 + $0x40] sm:$0xff]   ;;  %v2522_v26 = vld [vmem:[%s2877_s8 + $0x48] sm:$0xff]   ;;  %p2603_p0 = por %p2602_p10, %p2601_p12 }
  0x63   : > { %v2521_v25 = vld [vmem:[%s2877_s8 + $0xc0] sm:$0xff]   ;;  %v2523_v27 = vld [vmem:[%s2877_s8 + $0xc8] sm:$0xff]   ;;  %v2524_v28 = vld [vmem:[%s2877_s8 + $0x50] sm:$0xff]  }
  0x64   : > { %2328 = vmatpush3.bf16.msra.mxu0 %v2498_v2  ;;  %2413 = vmatpush3.bf16.msra.mxu1 %v2498_v2  ;;  %v2525_v29 = vld [vmem:[%s2877_s8 + $0xd0] sm:$0xff]   ;;  %v2526_v30 = vld [vmem:[%s2877_s8 + $0x58] sm:$0xff]   ;;  %v2528_v32 = vld [vmem:[%s2877_s8 + $0x60] sm:$0xff]   ;;  %p2604_p5 = pnand %p2603_p0, %p2597_p8 }
  0x65   : > { %2329 = vmatprep.subr.bf16.mxu0 %v2499_v3  ;;  %2406 = vmatprep.subr.bf16.mxu1 %v2499_v3  ;;  %v2527_v31 = vld [vmem:[%s2877_s8 + $0xd8] sm:$0xff]   ;;  %v2529_v33 = vld [vmem:[%s2877_s8 + $0xe0] sm:$0xff]   ;;  %v2530_v34 = vld [vmem:[%s2877_s8 + $0x68] sm:$0xff]  }
  0x66   : > { %v2531_v35 = vld [vmem:[%s2877_s8 + $0xe8] sm:$0xff]   ;;  %v2532_v36 = vld [vmem:[%s2877_s8 + $0x70] sm:$0xff]   ;;  %v2534_v38 = vld [vmem:[%s2877_s8 + $0x78] sm:$0xff]  }
  0x67   : > { %v2533_v37 = vld [vmem:[%s2877_s8 + $0xf0] sm:$0xff]   ;;  %v2535_v39 = vld [vmem:[%s2877_s8 + $0xf8] sm:$0xff]   ;;  %v2922_v40 = vld [vmem:[%s3150_s2] ss:$0 sm:$0xff] }
  0x68   : > { %2330 = vmatpush3.bf16.msra.mxu0 %v2499_v3  ;;  %2414 = vmatpush3.bf16.msra.mxu1 %v2499_v3  ;;  %v2927_v42 = vld [vmem:[%s3151_s3] ss:$0 sm:$0xff] }
  0x69   : > { %2331 = vmatprep.subr.bf16.mxu0 %v2500_v6  ;;  %2407 = vmatprep.subr.bf16.mxu1 %v2500_v6 }
  0x6c   : > { %2332 = vmatpush3.bf16.msra.mxu0 %v2500_v6  ;;  %2415 = vmatpush3.bf16.msra.mxu1 %v2500_v6 }
  0x6d   : > { %2333 = vmatprep.subr.bf16.mxu0 %v2501_v7  ;;  %2408 = vmatprep.subr.bf16.mxu1 %v2501_v7 }
  0x70   : > { %2334 = vmatpush3.bf16.msra.mxu0 %v2501_v7  ;;  %2416 = vmatpush3.bf16.msra.mxu1 %v2501_v7 }
  0x71   : > { %2335 = vmatprep.subr.bf16.mxu0 %v2502_v8  ;;  %2409 = vmatprep.subr.bf16.mxu1 %v2502_v8 }
  0x74   : > { %2336 = vmatpush3.bf16.msra.mxu0 %v2502_v8  ;;  %2417 = vmatpush3.bf16.msra.mxu1 %v2502_v8 }
  0x75   : > { %2337 = vmatprep.subr.bf16.mxu0 %v2503_v9  ;;  %2410 = vmatprep.subr.bf16.mxu1 %v2503_v9 }
  0x78   : > { %2338 = vmatpush3.bf16.msra.mxu0 %v2503_v9  ;;  %2418 = vmatpush3.bf16.msra.mxu1 %v2503_v9 }
  0x7b   : > { %2340 = vmatmul.mubr.bf16.vlgmr.msra.gmra.mrb[0].mxu0 %v2506_v10  ;;  %2372 = vmatmul.mubr.bf16.vlgmr.msra.gmra.mrb[0].mxu1 %v2507_v11 }
  0x7c   : > { %2343 = vmatprep.mubr.bf16.mxu0 %v2508_v12  ;;  %2375 = vmatprep.mubr.bf16.mxu1 %v2509_v13 }
  0x83   : > { %2344 = vmatmul.mubr.bf16.gmra.mrb[4].mxu0 %v2510_v14  ;;  %2376 = vmatmul.mubr.bf16.gmra.mrb[4].mxu1 %v2511_v15 }
  0x84   : > { %2347 = vmatprep.mubr.bf16.mxu0 %v2512_v16  ;;  %2379 = vmatprep.mubr.bf16.mxu1 %v2513_v17 }
  0x8b   : > { %2348 = vmatmul.mubr.bf16.gmra.mrb[8].mxu0 %v2514_v18  ;;  %2380 = vmatmul.mubr.bf16.gmra.mrb[8].mxu1 %v2515_v19 }
  0x8c   : > { %2351 = vmatprep.mubr.bf16.mxu0 %v2516_v20  ;;  %2383 = vmatprep.mubr.bf16.mxu1 %v2517_v21 }
  0x93   : > { %2352 = vmatmul.mubr.bf16.gmra.mrb[12].mxu0 %v2518_v22  ;;  %2384 = vmatmul.mubr.bf16.gmra.mrb[12].mxu1 %v2519_v23 }
  0x94   : > { %2355 = vmatprep.mubr.bf16.mxu0 %v2520_v24  ;;  %2387 = vmatprep.mubr.bf16.mxu1 %v2521_v25 }
  0x9b   : > { %2356 = vmatmul.mubr.bf16.gmra.mrb[16].mxu0 %v2522_v26  ;;  %2388 = vmatmul.mubr.bf16.gmra.mrb[16].mxu1 %v2523_v27 }
  0x9c   : > { %2359 = vmatprep.mubr.bf16.mxu0 %v2524_v28  ;;  %2391 = vmatprep.mubr.bf16.mxu1 %v2525_v29 }
  0xa3   : > { %2360 = vmatmul.mubr.bf16.gmra.mrb[20].mxu0 %v2526_v30  ;;  %2392 = vmatmul.mubr.bf16.gmra.mrb[20].mxu1 %v2527_v31 }
  0xa4   : > { %2363 = vmatprep.mubr.bf16.mxu0 %v2528_v32  ;;  %2395 = vmatprep.mubr.bf16.mxu1 %v2529_v33 }
  0xab   : > { %2364 = vmatmul.mubr.bf16.gmra.mrb[24].mxu0 %v2530_v34  ;;  %2396 = vmatmul.mubr.bf16.gmra.mrb[24].mxu1 %v2531_v35 }
  0xac   : > { %2367 = vmatprep.mubr.bf16.mxu0 %v2532_v36  ;;  %2399 = vmatprep.mubr.bf16.mxu1 %v2533_v37 }
  0xb3   : > { %2368 = vmatmul.mubr.bf16.gmra.mrb[28].mxu0 %v2534_v38  ;;  %2400 = vmatmul.mubr.bf16.gmra.mrb[28].mxu1 %v2535_v39 }
 0x14e   : > { %v2341_v41 = vpop.f32.mrb[0].mxu0  ;;  %v2373_v43 = vpop.f32.mrb[0].mxu1 }
 0x14f   : > { %v1243_v44 = vmul.f32 %v2341_v41, %v2922_v40  ;;  %v1275_v45 = vmul.f32 %v2373_v43, %v2922_v40  ;;  %v784_v46 = vpop.f32.mrb[1].mxu0  ;;  %v912_v47 = vpop.f32.mrb[1].mxu1 }
 0x150   : > { %v1241_v48 = vmul.f32 %v2922_v40, %v784_v46  ;;  %v1273_v49 = vmul.f32 %v2922_v40, %v912_v47  ;;  %v2342_v50 = vpop.f32.mrb[2].mxu0  ;;  %v2374_v51 = vpop.f32.mrb[2].mxu1 }
 0x151   : > { %v1314_v52 = vadd.f32 %v2927_v42, %v1243_v44  ;;  %v1346_v53 = vadd.f32 %v2927_v42, %v1275_v45  ;;  %v1244_v54 = vmul.f32 %v2342_v50, %v2922_v40  ;;  %v1276_v55 = vmul.f32 %v2374_v51, %v2922_v40  ;;  %v787_v56 = vpop.f32.mrb[3].mxu0  ;;  %v915_v57 = vpop.f32.mrb[3].mxu1 }
 0x152   : > { %v1312_v58 = vadd.f32 %v2927_v42, %v1241_v48  ;;  %v1344_v59 = vadd.f32 %v2927_v42, %v1273_v49  ;;  %v1242_v60 = vmul.f32 %v2922_v40, %v787_v56  ;;  %v1274_v61 = vmul.f32 %v2922_v40, %v915_v57 }
 0x153   : > { %v1315_v62 = vadd.f32 %v2927_v42, %v1244_v54  ;;  %v1347_v63 = vadd.f32 %v2927_v42, %v1276_v55  ;;  %v1378_v2 = vmax.f32 %v1314_v52, 0.0  ;;  %v1410_v3 = vmax.f32 %v1346_v53, 0.0 }
 0x154   : > { %v1313_v0 = vadd.f32 %v2927_v42, %v1242_v60  ;;  %v1345_v1 = vadd.f32 %v2927_v42, %v1274_v61  ;;  %v1376_v6 = vmax.f32 %v1312_v58, 0.0  ;;  %v1408_v7 = vmax.f32 %v1344_v59, 0.0 }
 0x155   : > { %v1379_v4 = vmax.f32 %v1315_v62, 0.0  ;;  %v1411_v5 = vmax.f32 %v1347_v63, 0.0 }
 0x156   : > { %v1377_v8 = vmax.f32 %v1313_v0, 0.0  ;;  %v1409_v9 = vmax.f32 %v1345_v1, 0.0  ;;  %v2345_v10 = vpop.f32.mrb[4].mxu0  ;;  %v2377_v11 = vpop.f32.mrb[4].mxu1 }
 0x157   : > { %v2100_v12 = vpack.c.bf16 %v1379_v4, %v1378_v2  ;;  %v2180_v13 = vpack.c.bf16 %v1411_v5, %v1410_v3  ;;  %v1247_v14 = vmul.f32 %v2345_v10, %v2922_v40  ;;  %v1279_v15 = vmul.f32 %v2377_v11, %v2922_v40  ;;  %v800_v16 = vpop.f32.mrb[5].mxu0  ;;  %v928_v17 = vpop.f32.mrb[5].mxu1 }
 0x158   : > { %v2095_v18 = vpack.c.bf16 %v1377_v8, %v1376_v6  ;;  %v2175_v19 = vpack.c.bf16 %v1409_v9, %v1408_v7  ;;  %v1245_v20 = vmul.f32 %v2922_v40, %v800_v16  ;;  %v1277_v21 = vmul.f32 %v2922_v40, %v928_v17  ;;  %v2346_v22 = vpop.f32.mrb[6].mxu0  ;;  %v2378_v23 = vpop.f32.mrb[6].mxu1 }
 0x159   : > { %2252 = vst [vmem:[%s2951_s21 + $0x8] sm:$0xff] %v2100_v12   ;;  %2268 = vst [vmem:[%s2951_s21 + $0x88] sm:$0xff] %v2180_v13   ;;  %v1318_v24 = vadd.f32 %v2927_v42, %v1247_v14  ;;  %v1350_v25 = vadd.f32 %v2927_v42, %v1279_v15  ;;  %v1248_v26 = vmul.f32 %v2346_v22, %v2922_v40  ;;  %v803_v28 = vpop.f32.mrb[7].mxu0  ;;  %v931_v29 = vpop.f32.mrb[7].mxu1 }
 0x15a   : > { %v1280_v27 = vmul.f32 %v2378_v23, %v2922_v40  ;;  %2096 = vst [vmem:[%s2951_s21] sm:$0xff] %v2095_v18   ;;  %2267 = vst [vmem:[%s2951_s21 + $0x80] sm:$0xff] %v2175_v19   ;;  %v1316_v30 = vadd.f32 %v2927_v42, %v1245_v20  ;;  %v1348_v31 = vadd.f32 %v2927_v42, %v1277_v21 }
 0x15b   : > { %v1246_v32 = vmul.f32 %v2922_v40, %v803_v28  ;;  %v1278_v33 = vmul.f32 %v2922_v40, %v931_v29  ;;  %v1319_v34 = vadd.f32 %v2927_v42, %v1248_v26  ;;  %v1382_v38 = vmax.f32 %v1318_v24, 0.0 }
 0x15c   : > { %v1351_v35 = vadd.f32 %v2927_v42, %v1280_v27  ;;  %v1414_v39 = vmax.f32 %v1350_v25, 0.0  ;;  %v1380_v44 = vmax.f32 %v1316_v30, 0.0  ;;  %v1412_v45 = vmax.f32 %v1348_v31, 0.0 }
 0x15d   : > { %v1317_v36 = vadd.f32 %v2927_v42, %v1246_v32  ;;  %v1349_v37 = vadd.f32 %v2927_v42, %v1278_v33  ;;  %v1383_v41 = vmax.f32 %v1319_v34, 0.0 }
 0x15e   : > { %v1415_v43 = vmax.f32 %v1351_v35, 0.0  ;;  %v2349_v48 = vpop.f32.mrb[8].mxu0  ;;  %v2381_v49 = vpop.f32.mrb[8].mxu1 }
 0x15f   : > { %v1381_v46 = vmax.f32 %v1317_v36, 0.0  ;;  %v1413_v47 = vmax.f32 %v1349_v37, 0.0  ;;  %v2110_v50 = vpack.c.bf16 %v1383_v41, %v1382_v38  ;;  %v1251_v52 = vmul.f32 %v2349_v48, %v2922_v40  ;;  %v816_v54 = vpop.f32.mrb[9].mxu0  ;;  %v944_v55 = vpop.f32.mrb[9].mxu1 }
 0x160   : > { %v2190_v51 = vpack.c.bf16 %v1415_v43, %v1414_v39  ;;  %v1283_v53 = vmul.f32 %v2381_v49, %v2922_v40  ;;  %v1249_v58 = vmul.f32 %v2922_v40, %v816_v54  ;;  %v1281_v59 = vmul.f32 %v2922_v40, %v944_v55  ;;  %v2350_v60 = vpop.f32.mrb[10].mxu0  ;;  %v2382_v61 = vpop.f32.mrb[10].mxu1 }
 0x161   : > { %v2105_v56 = vpack.c.bf16 %v1381_v46, %v1380_v44  ;;  %v2185_v57 = vpack.c.bf16 %v1413_v47, %v1412_v45  ;;  %2254 = vst [vmem:[%s2951_s21 + $0x18] sm:$0xff] %v2110_v50   ;;  %v1322_v62 = vadd.f32 %v2927_v42, %v1251_v52  ;;  %v1252_v0 = vmul.f32 %v2350_v60, %v2922_v40  ;;  %v819_v2 = vpop.f32.mrb[11].mxu0  ;;  %v947_v3 = vpop.f32.mrb[11].mxu1 }
 0x162   : > { %2270 = vst [vmem:[%s2951_s21 + $0x98] sm:$0xff] %v2190_v51   ;;  %v1354_v63 = vadd.f32 %v2927_v42, %v1283_v53  ;;  %v1284_v1 = vmul.f32 %v2382_v61, %v2922_v40  ;;  %v1320_v4 = vadd.f32 %v2927_v42, %v1249_v58  ;;  %v1352_v5 = vadd.f32 %v2927_v42, %v1281_v59 }
 0x163   : > { %2253 = vst [vmem:[%s2951_s21 + $0x10] sm:$0xff] %v2105_v56   ;;  %2269 = vst [vmem:[%s2951_s21 + $0x90] sm:$0xff] %v2185_v57   ;;  %v1250_v6 = vmul.f32 %v2922_v40, %v819_v2  ;;  %v1282_v7 = vmul.f32 %v2922_v40, %v947_v3  ;;  %v1323_v8 = vadd.f32 %v2927_v42, %v1252_v0  ;;  %v1386_v12 = vmax.f32 %v1322_v62, 0.0 }
 0x164   : > { %v1355_v9 = vadd.f32 %v2927_v42, %v1284_v1  ;;  %v1418_v13 = vmax.f32 %v1354_v63, 0.0  ;;  %v1384_v16 = vmax.f32 %v1320_v4, 0.0  ;;  %v1416_v17 = vmax.f32 %v1352_v5, 0.0 }
 0x165   : > { %v1321_v10 = vadd.f32 %v2927_v42, %v1250_v6  ;;  %v1353_v11 = vadd.f32 %v2927_v42, %v1282_v7  ;;  %v1387_v14 = vmax.f32 %v1323_v8, 0.0 }
 0x166   : > { %v1419_v15 = vmax.f32 %v1355_v9, 0.0  ;;  %v2353_v20 = vpop.f32.mrb[12].mxu0  ;;  %v2385_v21 = vpop.f32.mrb[12].mxu1 }
 0x167   : > { %v1385_v18 = vmax.f32 %v1321_v10, 0.0  ;;  %v1417_v19 = vmax.f32 %v1353_v11, 0.0  ;;  %v2120_v22 = vpack.c.bf16 %v1387_v14, %v1386_v12  ;;  %v1255_v24 = vmul.f32 %v2353_v20, %v2922_v40  ;;  %v832_v26 = vpop.f32.mrb[13].mxu0  ;;  %v960_v27 = vpop.f32.mrb[13].mxu1 }
 0x168   : > { %v2200_v23 = vpack.c.bf16 %v1419_v15, %v1418_v13  ;;  %v1287_v25 = vmul.f32 %v2385_v21, %v2922_v40  ;;  %v1253_v30 = vmul.f32 %v2922_v40, %v832_v26  ;;  %v1285_v31 = vmul.f32 %v2922_v40, %v960_v27  ;;  %v2354_v32 = vpop.f32.mrb[14].mxu0  ;;  %v2386_v33 = vpop.f32.mrb[14].mxu1 }
 0x169   : > { %v2115_v28 = vpack.c.bf16 %v1385_v18, %v1384_v16  ;;  %v2195_v29 = vpack.c.bf16 %v1417_v19, %v1416_v17  ;;  %2256 = vst [vmem:[%s2951_s21 + $0x28] sm:$0xff] %v2120_v22   ;;  %v1326_v34 = vadd.f32 %v2927_v42, %v1255_v24  ;;  %v1256_v36 = vmul.f32 %v2354_v32, %v2922_v40  ;;  %v835_v38 = vpop.f32.mrb[15].mxu0  ;;  %v963_v39 = vpop.f32.mrb[15].mxu1 }
 0x16a   : > { %2272 = vst [vmem:[%s2951_s21 + $0xa8] sm:$0xff] %v2200_v23   ;;  %v1358_v35 = vadd.f32 %v2927_v42, %v1287_v25  ;;  %v1288_v37 = vmul.f32 %v2386_v33, %v2922_v40  ;;  %v1324_v41 = vadd.f32 %v2927_v42, %v1253_v30  ;;  %v1356_v43 = vadd.f32 %v2927_v42, %v1285_v31 }
 0x16b   : > { %2255 = vst [vmem:[%s2951_s21 + $0x20] sm:$0xff] %v2115_v28   ;;  %2271 = vst [vmem:[%s2951_s21 + $0xa0] sm:$0xff] %v2195_v29   ;;  %v1254_v44 = vmul.f32 %v2922_v40, %v835_v38  ;;  %v1286_v45 = vmul.f32 %v2922_v40, %v963_v39  ;;  %v1327_v46 = vadd.f32 %v2927_v42, %v1256_v36  ;;  %v1390_v50 = vmax.f32 %v1326_v34, 0.0 }
 0x16c   : > { %v1359_v47 = vadd.f32 %v2927_v42, %v1288_v37  ;;  %v1422_v51 = vmax.f32 %v1358_v35, 0.0  ;;  %v1388_v54 = vmax.f32 %v1324_v41, 0.0  ;;  %v1420_v55 = vmax.f32 %v1356_v43, 0.0 }
 0x16d   : > { %v1325_v48 = vadd.f32 %v2927_v42, %v1254_v44  ;;  %v1357_v49 = vadd.f32 %v2927_v42, %v1286_v45  ;;  %v1391_v52 = vmax.f32 %v1327_v46, 0.0 }
 0x16e   : > { %v1423_v53 = vmax.f32 %v1359_v47, 0.0  ;;  %v2357_v58 = vpop.f32.mrb[16].mxu0  ;;  %v2389_v59 = vpop.f32.mrb[16].mxu1 }
 0x16f   : > { %v1389_v56 = vmax.f32 %v1325_v48, 0.0  ;;  %v1421_v57 = vmax.f32 %v1357_v49, 0.0  ;;  %v2130_v60 = vpack.c.bf16 %v1391_v52, %v1390_v50  ;;  %v1259_v62 = vmul.f32 %v2357_v58, %v2922_v40  ;;  %v848_v0 = vpop.f32.mrb[17].mxu0  ;;  %v976_v1 = vpop.f32.mrb[17].mxu1 }
 0x170   : > { %v2210_v61 = vpack.c.bf16 %v1423_v53, %v1422_v51  ;;  %v1291_v63 = vmul.f32 %v2389_v59, %v2922_v40  ;;  %v1257_v4 = vmul.f32 %v2922_v40, %v848_v0  ;;  %v1289_v5 = vmul.f32 %v2922_v40, %v976_v1  ;;  %v2358_v6 = vpop.f32.mrb[18].mxu0  ;;  %v2390_v7 = vpop.f32.mrb[18].mxu1 }
 0x171   : > { %v2125_v2 = vpack.c.bf16 %v1389_v56, %v1388_v54  ;;  %v2205_v3 = vpack.c.bf16 %v1421_v57, %v1420_v55  ;;  %2258 = vst [vmem:[%s2951_s21 + $0x38] sm:$0xff] %v2130_v60   ;;  %v1330_v8 = vadd.f32 %v2927_v42, %v1259_v62  ;;  %v1260_v10 = vmul.f32 %v2358_v6, %v2922_v40  ;;  %v851_v12 = vpop.f32.mrb[19].mxu0  ;;  %v979_v13 = vpop.f32.mrb[19].mxu1 }
 0x172   : > { %2274 = vst [vmem:[%s2951_s21 + $0xb8] sm:$0xff] %v2210_v61   ;;  %v1362_v9 = vadd.f32 %v2927_v42, %v1291_v63  ;;  %v1292_v11 = vmul.f32 %v2390_v7, %v2922_v40  ;;  %v1328_v14 = vadd.f32 %v2927_v42, %v1257_v4  ;;  %v1360_v15 = vadd.f32 %v2927_v42, %v1289_v5 }
 0x173   : > { %2257 = vst [vmem:[%s2951_s21 + $0x30] sm:$0xff] %v2125_v2   ;;  %2273 = vst [vmem:[%s2951_s21 + $0xb0] sm:$0xff] %v2205_v3   ;;  %v1258_v16 = vmul.f32 %v2922_v40, %v851_v12  ;;  %v1290_v17 = vmul.f32 %v2922_v40, %v979_v13  ;;  %v1331_v18 = vadd.f32 %v2927_v42, %v1260_v10  ;;  %v1394_v22 = vmax.f32 %v1330_v8, 0.0 }
 0x174   : > { %v1363_v19 = vadd.f32 %v2927_v42, %v1292_v11  ;;  %v1426_v23 = vmax.f32 %v1362_v9, 0.0  ;;  %v1392_v26 = vmax.f32 %v1328_v14, 0.0  ;;  %v1424_v27 = vmax.f32 %v1360_v15, 0.0 }
 0x175   : > { %v1329_v20 = vadd.f32 %v2927_v42, %v1258_v16  ;;  %v1361_v21 = vadd.f32 %v2927_v42, %v1290_v17  ;;  %v1395_v24 = vmax.f32 %v1331_v18, 0.0 }
 0x176   : > { %v1427_v25 = vmax.f32 %v1363_v19, 0.0  ;;  %v2361_v30 = vpop.f32.mrb[20].mxu0  ;;  %v2393_v31 = vpop.f32.mrb[20].mxu1 }
 0x177   : > { %v1393_v28 = vmax.f32 %v1329_v20, 0.0  ;;  %v1425_v29 = vmax.f32 %v1361_v21, 0.0  ;;  %v2140_v32 = vpack.c.bf16 %v1395_v24, %v1394_v22  ;;  %v1263_v34 = vmul.f32 %v2361_v30, %v2922_v40  ;;  %v864_v36 = vpop.f32.mrb[21].mxu0  ;;  %v992_v37 = vpop.f32.mrb[21].mxu1 }
 0x178   : > { %v2220_v33 = vpack.c.bf16 %v1427_v25, %v1426_v23  ;;  %v1295_v35 = vmul.f32 %v2393_v31, %v2922_v40  ;;  %v1261_v41 = vmul.f32 %v2922_v40, %v864_v36  ;;  %v1293_v43 = vmul.f32 %v2922_v40, %v992_v37  ;;  %v2362_v44 = vpop.f32.mrb[22].mxu0  ;;  %v2394_v45 = vpop.f32.mrb[22].mxu1 }
 0x179   : > { %v2135_v38 = vpack.c.bf16 %v1393_v28, %v1392_v26  ;;  %v2215_v39 = vpack.c.bf16 %v1425_v29, %v1424_v27  ;;  %2260 = vst [vmem:[%s2951_s21 + $0x48] sm:$0xff] %v2140_v32   ;;  %v1334_v46 = vadd.f32 %v2927_v42, %v1263_v34  ;;  %v1264_v48 = vmul.f32 %v2362_v44, %v2922_v40  ;;  %v867_v50 = vpop.f32.mrb[23].mxu0  ;;  %v995_v51 = vpop.f32.mrb[23].mxu1 }
 0x17a   : > { %2276 = vst [vmem:[%s2951_s21 + $0xc8] sm:$0xff] %v2220_v33   ;;  %v1366_v47 = vadd.f32 %v2927_v42, %v1295_v35  ;;  %v1296_v49 = vmul.f32 %v2394_v45, %v2922_v40  ;;  %v1332_v52 = vadd.f32 %v2927_v42, %v1261_v41  ;;  %v1364_v53 = vadd.f32 %v2927_v42, %v1293_v43 }
 0x17b   : > { %2259 = vst [vmem:[%s2951_s21 + $0x40] sm:$0xff] %v2135_v38   ;;  %2275 = vst [vmem:[%s2951_s21 + $0xc0] sm:$0xff] %v2215_v39   ;;  %v1262_v54 = vmul.f32 %v2922_v40, %v867_v50  ;;  %v1294_v55 = vmul.f32 %v2922_v40, %v995_v51  ;;  %v1335_v56 = vadd.f32 %v2927_v42, %v1264_v48  ;;  %v1398_v60 = vmax.f32 %v1334_v46, 0.0 }
 0x17c   : > { %v1367_v57 = vadd.f32 %v2927_v42, %v1296_v49  ;;  %v1430_v61 = vmax.f32 %v1366_v47, 0.0  ;;  %v1396_v0 = vmax.f32 %v1332_v52, 0.0  ;;  %v1428_v1 = vmax.f32 %v1364_v53, 0.0 }
 0x17d   : > { %v1333_v58 = vadd.f32 %v2927_v42, %v1262_v54  ;;  %v1365_v59 = vadd.f32 %v2927_v42, %v1294_v55  ;;  %v1399_v62 = vmax.f32 %v1335_v56, 0.0 }
 0x17e   : > { %v1431_v63 = vmax.f32 %v1367_v57, 0.0  ;;  %v2365_v4 = vpop.f32.mrb[24].mxu0  ;;  %v2397_v5 = vpop.f32.mrb[24].mxu1 }
 0x17f   : > { %v1397_v2 = vmax.f32 %v1333_v58, 0.0  ;;  %v1429_v3 = vmax.f32 %v1365_v59, 0.0  ;;  %v2150_v6 = vpack.c.bf16 %v1399_v62, %v1398_v60  ;;  %v1267_v8 = vmul.f32 %v2365_v4, %v2922_v40  ;;  %v880_v10 = vpop.f32.mrb[25].mxu0  ;;  %v1008_v11 = vpop.f32.mrb[25].mxu1 }
 0x180   : > { %v2230_v7 = vpack.c.bf16 %v1431_v63, %v1430_v61  ;;  %v1299_v9 = vmul.f32 %v2397_v5, %v2922_v40  ;;  %v1265_v14 = vmul.f32 %v2922_v40, %v880_v10  ;;  %v1297_v15 = vmul.f32 %v2922_v40, %v1008_v11  ;;  %v2366_v16 = vpop.f32.mrb[26].mxu0  ;;  %v2398_v17 = vpop.f32.mrb[26].mxu1 }
 0x181   : > { %v2145_v12 = vpack.c.bf16 %v1397_v2, %v1396_v0  ;;  %v2225_v13 = vpack.c.bf16 %v1429_v3, %v1428_v1  ;;  %2262 = vst [vmem:[%s2951_s21 + $0x58] sm:$0xff] %v2150_v6   ;;  %v1338_v18 = vadd.f32 %v2927_v42, %v1267_v8  ;;  %v1268_v20 = vmul.f32 %v2366_v16, %v2922_v40  ;;  %v883_v22 = vpop.f32.mrb[27].mxu0  ;;  %v1011_v23 = vpop.f32.mrb[27].mxu1 }
 0x182   : > { %2278 = vst [vmem:[%s2951_s21 + $0xd8] sm:$0xff] %v2230_v7   ;;  %v1370_v19 = vadd.f32 %v2927_v42, %v1299_v9  ;;  %v1300_v21 = vmul.f32 %v2398_v17, %v2922_v40  ;;  %v1336_v24 = vadd.f32 %v2927_v42, %v1265_v14  ;;  %v1368_v25 = vadd.f32 %v2927_v42, %v1297_v15 }
 0x183   : > { %2261 = vst [vmem:[%s2951_s21 + $0x50] sm:$0xff] %v2145_v12   ;;  %2277 = vst [vmem:[%s2951_s21 + $0xd0] sm:$0xff] %v2225_v13   ;;  %v1266_v26 = vmul.f32 %v2922_v40, %v883_v22  ;;  %v1298_v27 = vmul.f32 %v2922_v40, %v1011_v23  ;;  %v1339_v28 = vadd.f32 %v2927_v42, %v1268_v20  ;;  %v1402_v32 = vmax.f32 %v1338_v18, 0.0 }
 0x184   : > { %v1371_v29 = vadd.f32 %v2927_v42, %v1300_v21  ;;  %v1434_v33 = vmax.f32 %v1370_v19, 0.0  ;;  %v1400_v36 = vmax.f32 %v1336_v24, 0.0  ;;  %v1432_v37 = vmax.f32 %v1368_v25, 0.0 }
 0x185   : > { %v1337_v30 = vadd.f32 %v2927_v42, %v1266_v26  ;;  %v1369_v31 = vadd.f32 %v2927_v42, %v1298_v27  ;;  %v1403_v34 = vmax.f32 %v1339_v28, 0.0 }
 0x186   : > { %v1435_v35 = vmax.f32 %v1371_v29, 0.0  ;;  %v2369_v41 = vpop.f32.mrb[28].mxu0  ;;  %v2401_v43 = vpop.f32.mrb[28].mxu1 }
 0x187   : > { %v1401_v38 = vmax.f32 %v1337_v30, 0.0  ;;  %v1433_v39 = vmax.f32 %v1369_v31, 0.0  ;;  %v2160_v44 = vpack.c.bf16 %v1403_v34, %v1402_v32  ;;  %v1271_v46 = vmul.f32 %v2369_v41, %v2922_v40  ;;  %v896_v48 = vpop.f32.mrb[29].mxu0  ;;  %v1024_v49 = vpop.f32.mrb[29].mxu1 }
 0x188   : > { %v2240_v45 = vpack.c.bf16 %v1435_v35, %v1434_v33  ;;  %v1303_v47 = vmul.f32 %v2401_v43, %v2922_v40  ;;  %v1269_v52 = vmul.f32 %v2922_v40, %v896_v48  ;;  %v1301_v53 = vmul.f32 %v2922_v40, %v1024_v49  ;;  %v2370_v54 = vpop.f32.mrb[30].mxu0  ;;  %v2402_v55 = vpop.f32.mrb[30].mxu1 }
 0x189   : > { %v2155_v50 = vpack.c.bf16 %v1401_v38, %v1400_v36  ;;  %v2235_v51 = vpack.c.bf16 %v1433_v39, %v1432_v37  ;;  %2264 = vst [vmem:[%s2951_s21 + $0x68] sm:$0xff] %v2160_v44   ;;  %v1342_v56 = vadd.f32 %v2927_v42, %v1271_v46  ;;  %v1272_v58 = vmul.f32 %v2370_v54, %v2922_v40  ;;  %v899_v60 = vpop.f32.mrb[31].mxu0  ;;  %v1027_v61 = vpop.f32.mrb[31].mxu1 }
 0x18a   : > { %2280 = vst [vmem:[%s2951_s21 + $0xe8] sm:$0xff] %v2240_v45   ;;  %v1374_v57 = vadd.f32 %v2927_v42, %v1303_v47  ;;  %v1304_v59 = vmul.f32 %v2402_v55, %v2922_v40  ;;  %v1340_v62 = vadd.f32 %v2927_v42, %v1269_v52  ;;  %v1372_v63 = vadd.f32 %v2927_v42, %v1301_v53 }
 0x18b   : > { %2263 = vst [vmem:[%s2951_s21 + $0x60] sm:$0xff] %v2155_v50   ;;  %2279 = vst [vmem:[%s2951_s21 + $0xe0] sm:$0xff] %v2235_v51   ;;  %v1270_v0 = vmul.f32 %v2922_v40, %v899_v60  ;;  %v1302_v1 = vmul.f32 %v2922_v40, %v1027_v61  ;;  %v1343_v2 = vadd.f32 %v2927_v42, %v1272_v58  ;;  %v1406_v6 = vmax.f32 %v1342_v56, 0.0 }
 0x18c   : > { %v1375_v3 = vadd.f32 %v2927_v42, %v1304_v59  ;;  %v1438_v7 = vmax.f32 %v1374_v57, 0.0  ;;  %v1404_v40 = vmax.f32 %v1340_v62, 0.0  ;;  %v1436_v10 = vmax.f32 %v1372_v63, 0.0 }
 0x18d   : > { %v1341_v4 = vadd.f32 %v2927_v42, %v1270_v0  ;;  %v1373_v5 = vadd.f32 %v2927_v42, %v1302_v1  ;;  %v1407_v8 = vmax.f32 %v1343_v2, 0.0 }
 0x18e   : > { %v1439_v9 = vmax.f32 %v1375_v3, 0.0 }
 0x18f   : > { %v1405_v11 = vmax.f32 %v1341_v4, 0.0  ;;  %v1437_v12 = vmax.f32 %v1373_v5, 0.0  ;;  %v2170_v13 = vpack.c.bf16 %v1407_v8, %v1406_v6 }
 0x190   : > { %v2250_v14 = vpack.c.bf16 %v1439_v9, %v1438_v7 }
 0x191   : > { %v2165_v42 = vpack.c.bf16 %v1405_v11, %v1404_v40  ;;  %v2245_v15 = vpack.c.bf16 %v1437_v12, %v1436_v10  ;;  %2266 = vst [vmem:[%s2951_s21 + $0x78] sm:$0xff] %v2170_v13  }
 0x192   : > { %2282 = vst [vmem:[%s2951_s21 + $0xf8] sm:$0xff] %v2250_v14  }
 0x193   : > { %2265 = vst [vmem:[%s2951_s21 + $0x70] sm:$0xff] %v2165_v42   ;;  %2281 = vst [vmem:[%s2951_s21 + $0xf0] sm:$0xff] %v2245_v15  }
 0x194   : > { %2607 = shalt.err (!%p2604_p5)
}
 0x195   : > { %s2608_s8 = scalar_lea.hbm %s3094_s18, 4096  ;;  %s2612_s27 = scalar_lea.hbm %s3152_s4, 12288 }
 0x196   : > { %p2609_p9 = scmp.ne.s32.totalorder %s3094_s18, %s2608_s8  ;;  %p2613_p3 = scmp.lt.u32.totalorder %s3094_s18, %s3152_s4 }
 0x197   : > { %p2614_p7 = scmp.lt.u32.totalorder %s2612_s27, %s2608_s8  ;;  %p2616_p4 = scmp.lt.u32.totalorder %s2608_s8, %s3094_s18 }
 0x198   : > { %p2610_p1 = pnand %p2609_p9, %p2812_p11 }
 0x199   : > { %p2615_p13 = por %p2614_p7, %p2613_p3 }
 0x19a   : > { %p2611_p2 = pneg %p2610_p1 }
 0x19b   : > { %p2617_p6 = por %p2616_p4, %p2615_p13 }
 0x19d   : > { %p2618_p8 = pnand %p2617_p6, %p2611_p2 }
 0x19f   : > { %2621 = shalt.err (!%p2618_p8)
}
 0x1a0   : > { %s2687_s22 = smov 64   ;;  %s2688_s6 = smov 4  }
 0x1a1   : > { %2425 = dma.vmem_to_hbm [thread:$0]  (%p2812_p11), %s3096_s28, 4096, %s3094_s18, %s1761_s9, %s2687_s22, %s2687_s22, %s2688_s6  }
 0x1a2 PF: > { %p2442_p12 = scmp.ge.s32.totalorder %s2680_s20, 2  ;;  %s1790_s29 = sand.u32 1, %s2660_s15  }
 0x1a3   : > { %p3170_p10 = scmp.ne.s32.totalorder %s3160_s26, 0  ;;  %s1791_s11 = scalar_lea.sflag [#allocation5], %s1790_s29 }
 0x1a5   : > { %p2436_p0 = pnand %p2442_p12, %p3170_p10 }
 0x1a7   : > { %2655 = dma.done.wait (!%p2436_p0), %s1791_s11, 4096  }
 0x1a8   : > { %2657 = vsyncadd (!%p2436_p0), %s1791_s11, 4294963200  ;;  %s21_s20 = sadd.s32 1, %s2680_s20   ;;  %s3171_s15 = smov %s2664_s16 }
 0x1a9   : > { %p18_p5 = scmp.ge.s32.totalorder %s21_s20, 5   ;;  %s3172_s16 = smov %s2668_s17 }
 0x1aa   : > { %s3173_s17 = smov %s2821_s10  ;;  %s3174_s18 = smov %s2676_s19 }
 0x1ab   : > { %s3175_s19 = smov %s3177_s5  ;;  %20 = sbr.rel (!%p18_p5) target bundleno = 7 (0x7), region = 100 }
 0x1b2   :  { %1796 = vsyncpa [#allocation4], 1 }
 0x1b3   :  { %1798 = vsyncpa [#allocation4 + $0x1], 1 }
 0x1b4   :  { %1799 = vsyncpa [#allocation7], 1 }
 0x1b5   :  { %1800 = vsyncpa [#allocation5], 1 }
 0x1b6   :  { %1802 = vsyncpa [#allocation5 + $0x1], 1 }

</bundles_post_ra>
